<compile_context>
chip_gen: v7x
topology: tpu7x:2x2x1
jax: 0.10.0
libtpu: 0.0.40
codegen_flags: <defaults>
</compile_context>

<pallas_src>
import numpy as np
import jax
import jax.numpy as jnp
from jax.experimental import pallas as pl
from jax.experimental.pallas import tpu as pltpu


def _round_up(x, m):
    return ((x + m - 1) // m) * m


def _const_spec(shape):
    """BlockSpec for a grid-invariant operand, single-buffered when supported."""
    imap = lambda b, jt: (0, 0)
    try:
        return pl.BlockSpec(shape, imap, pipeline_mode=pl.Buffered(1))
    except Exception:  # older jax without pipeline_mode / Buffered
        return pl.BlockSpec(shape, imap)


def _make_kernel(T, tau, F_pad, n_fft, hop, R, Rpad, mm_dtype):
    def kernel(x_ref, w_ref, b_ref, basis_ref, inv_env_ref, o_ref, carry_ref):
        jt = pl.program_id(1)

        # Reset the overlap-add carry at the first frame-tile of each batch item.
        @pl.when(jt == 0)
        def _():
            carry_ref[...] = jnp.zeros_like(carry_ref)

        # ---- Linear head on the MXU (bf16 in, f32 accumulate) -------------------
        x = x_ref[0]                                                   # (tau, D)
        h = jnp.dot(x, w_ref[...], preferred_element_type=jnp.float32) + b_ref[...]
        hm = h[:, :F_pad]                                              # lane-aligned split
        hp = h[:, F_pad:]
        mag = jnp.minimum(jnp.exp(hm), 100.0)                          # exp + clip(max=100)

        # Zero the zero-padded tail frames (t >= T) so they add nothing to the OLA.
        fidx = jt * tau + jax.lax.broadcasted_iota(jnp.int32, (tau, 1), 0)
        mag = jnp.where(fidx < T, mag, 0.0)

        # Fused inverse-rDFT * synthesis window: one [real | imag] @ [Br; Bi] matmul.
        spec = jnp.concatenate([mag * jnp.cos(hp), mag * jnp.sin(hp)], axis=-1)
        frames = jnp.dot(spec.astype(mm_dtype), basis_ref[...],
                         preferred_element_type=jnp.float32)           # (tau, n_fft)

        # ---- overlap-add: lane-aligned column chunks shifted with pltpu.roll ----
        frames_p = jnp.concatenate(
            [frames, jnp.zeros((Rpad, n_fft), jnp.float32)], axis=0)   # (tau+Rpad, n_fft)
        total = jnp.concatenate(
            [carry_ref[...], jnp.zeros((tau, hop), jnp.float32)], axis=0)  # (tau+Rpad, hop)
        for r in range(R):                                             # R is small & static
            ch = frames_p[:, r * hop:(r + 1) * hop]                    # (tau+Rpad, hop)
            total = total + (pltpu.roll(ch, shift=r, axis=0) if r else ch)

        # Completed rows: multiply by precomputed reciprocal OLA envelope, store once.
        o_ref[0] = total[:tau] * inv_env_ref[...]
        # Partial tail rows become the carry for the next frame tile.
        carry_ref[...] = total[tau:]

    return kernel


def istft_head_forward(x, weight, bias, *, n_fft, hop, tile_t=256,
                       matmul_dtype=jnp.bfloat16):
    """ISTFTHead forward.

    x      : (B, T, D) float32
    weight : (n_fft+2, D)  PyTorch Linear weight (self.out)
    bias   : (n_fft+2,)    PyTorch Linear bias
    returns: (B, (T-1)*hop) float32 audio (matches torch.istft(center=True)).
    """
    B, T, D = x.shape
    F = n_fft // 2 + 1
    R = n_fft // hop
    assert weight.shape == (n_fft + 2, D)
    assert n_fft % hop == 0 and (n_fft // 2) % hop == 0
    assert T >= 2

    mm = matmul_dtype
    itemsize = jnp.dtype(mm).itemsize
    sub_align = 16 if itemsize < 4 else 8

    F_pad = _round_up(F, 128)
    Rpad = _round_up(max(R - 1, 1), 8)

    # Frame-tile size: sublane aligned, at least Rpad; cover T + R//2 output rows.
    T_need = T + R // 2
    tau = max(min(_round_up(tile_t, sub_align), _round_up(T_need, sub_align)), Rpad)
    n_tiles = pl.cdiv(T_need, tau)
    T_pad = n_tiles * tau

    # ---------------- constant / parameter setup (one-off glue) ----------------
    n = np.arange(n_fft, dtype=np.float64)
    win = 0.5 - 0.5 * np.cos(2.0 * np.pi * n / n_fft)                 # periodic hann
    k = np.arange(F, dtype=np.float64)[:, None]
    ang = 2.0 * np.pi * k * n[None, :] / n_fft
    c = np.ones((F, 1)); c[1:-1] = 2.0                                # one-sided weights
    basis_r = (c * np.cos(ang) / n_fft) * win[None, :]                # (F, n_fft)
    basis_i = (-c * np.sin(ang) / n_fft) * win[None, :]               # (F, n_fft)
    basis_stack = np.zeros((2 * F_pad, n_fft), np.float64)            # [Br ; 0 ; Bi ; 0]
    basis_stack[:F] = basis_r
    basis_stack[F_pad:F_pad + F] = basis_i

    # Repack Linear weight channels-last, mag|phase each zero-padded to F_pad lanes.
    w_np = np.asarray(weight, np.float64)
    b_np = np.asarray(bias, np.float64)
    w_all = np.zeros((D, 2 * F_pad), np.float64)
    b_all = np.zeros((1, 2 * F_pad), np.float64)
    w_all[:, :F] = w_np[:F].T
    w_all[:, F_pad:F_pad + F] = w_np[F:].T
    b_all[0, :F] = b_np[:F]
    b_all[0, F_pad:F_pad + F] = b_np[F:]

    # Squared-window OLA envelope -> precomputed reciprocal (no divides in kernel).
    wsq = win ** 2
    L_env = max(T_pad, T + R - 1)
    env2d = np.zeros((L_env, hop), np.float64)
    for r in range(R):
        env2d[r:r + T, :] += wsq[r * hop:(r + 1) * hop][None, :]
    inv_env = (1.0 / (env2d + 1e-8))[:T_pad]

    w_all_j = jnp.asarray(w_all, mm)
    b_all_j = jnp.asarray(b_all, jnp.float32)
    basis_j = jnp.asarray(basis_stack, mm)
    inv_env_j = jnp.asarray(inv_env, jnp.float32)
    x_pad = jnp.pad(x.astype(jnp.float32), ((0, 0), (0, T_pad - T), (0, 0))).astype(mm)

    kernel = _make_kernel(T, tau, F_pad, n_fft, hop, R, Rpad, mm)

    # Cost estimate + explicit scoped-VMEM budget.
    flops = 2 * B * T_pad * D * (2 * F_pad) + 2 * B * T_pad * (2 * F_pad) * n_fft
    transcendentals = 3 * B * T_pad * F_pad
    bytes_accessed = (B * T_pad * D * itemsize + 2 * B * T_pad * hop * 4
                      + D * 2 * F_pad * itemsize + 2 * F_pad * n_fft * itemsize)
    block_bytes = (2 * tau * D * itemsize + D * 2 * F_pad * itemsize + 2 * F_pad * 4
                   + 2 * F_pad * n_fft * itemsize + 4 * tau * hop * 4 + Rpad * hop * 4)
    temp_bytes = (3 * tau * 2 * F_pad * 4 + 2 * tau * n_fft * 4
                  + 2 * (tau + Rpad) * hop * 4)
    vmem_limit = int(min(64 * 1024 * 1024,
                         max(16 * 1024 * 1024, 2 * (block_bytes + temp_bytes))))

    out_full = pl.pallas_call(
        kernel,
        out_shape=jax.ShapeDtypeStruct((B, T_pad, hop), jnp.float32),
        grid_spec=pltpu.PrefetchScalarGridSpec(
            num_scalar_prefetch=0,
            grid=(B, n_tiles),
            in_specs=[
                pl.BlockSpec((1, tau, D), lambda b, jt: (b, jt, 0)),   # x frame tile
                _const_spec((D, 2 * F_pad)),                            # Linear weight
                _const_spec((1, 2 * F_pad)),                            # Linear bias
                _const_spec((2 * F_pad, n_fft)),                        # fused iDFT basis
                pl.BlockSpec((tau, hop), lambda b, jt: (jt, 0)),        # 1/envelope tile
            ],
            out_specs=pl.BlockSpec((1, tau, hop), lambda b, jt: (b, jt, 0)),
            scratch_shapes=[pltpu.VMEM((Rpad, hop), jnp.float32)],      # OLA carry
        ),
        compiler_params=pltpu.CompilerParams(
            dimension_semantics=("parallel", "arbitrary"),
            vmem_limit_bytes=vmem_limit,
        ),
        cost_estimate=pl.CostEstimate(flops=flops,
                                      transcendentals=transcendentals,
                                      bytes_accessed=bytes_accessed),
    )(x_pad, w_all_j, b_all_j, basis_j, inv_env_j)

    # Center trim of n_fft//2 samples (= R//2 aligned rows) per side, then flatten.
    audio2d = out_full[:, R // 2: R // 2 + T - 1, :]
    return audio2d.reshape(B, (T - 1) * hop)


def istft_head_reference(x, weight, bias, *, n_fft, hop):
    """Pure numpy reference (np.fft.irfft) with identical semantics."""
    x = np.asarray(x, np.float32)
    weight = np.asarray(weight, np.float32)
    bias = np.asarray(bias, np.float32)
    B, T, D = x.shape
    F = n_fft // 2 + 1
    h = x @ weight.T + bias                                       # (B, T, n_fft+2)
    mag = np.minimum(np.exp(h[..., :F]), 100.0)
    p = h[..., F:]
    spec = mag * np.cos(p) + 1j * mag * np.sin(p)                 # (B, T, F)
    n = np.arange(n_fft)
    win = 0.5 - 0.5 * np.cos(2.0 * np.pi * n / n_fft)
    frames = np.fft.irfft(spec, n=n_fft, axis=-1) * win           # (B, T, n_fft)
    L = (T - 1) * hop + n_fft
    out = np.zeros((B, L)); env = np.zeros(L)
    for t in range(T):
        out[:, t * hop:t * hop + n_fft] += frames[:, t]
        env[t * hop:t * hop + n_fft] += win ** 2
    out = out / (env[None, :] + 1e-8)
    pad = n_fft // 2
    return out[:, pad:pad + (T - 1) * hop].astype(np.float32)


if __name__ == "__main__":
    B, T, D = 2, 8, 32          # batch, STFT frames, hidden dim (small test shapes)
    n_fft, hop = 16, 4          # synthetic STFT config (module uses e.g. 1024/256)

    key = jax.random.PRNGKey(0)
    kx, kw, kb, kx2 = jax.random.split(key, 4)
    x = jax.random.normal(kx, (B, T, D), jnp.float32)
    # self.out is assigned externally in the original module; synthesize Linear(D, n_fft+2).
    weight = 0.1 * jax.random.normal(kw, (n_fft + 2, D), jnp.float32)
    bias = 0.1 * jax.random.normal(kb, (n_fft + 2,), jnp.float32)

    ref = istft_head_reference(x, weight, bias, n_fft=n_fft, hop=hop)

    # Exact-semantics check (f32 matmuls).
    audio_f32 = jax.block_until_ready(
        istft_head_forward(x, weight, bias, n_fft=n_fft, hop=hop,
                           matmul_dtype=jnp.float32))
    assert audio_f32.shape == (B, (T - 1) * hop)
    np.testing.assert_allclose(np.asarray(audio_f32), ref, rtol=2e-3, atol=2e-3)

    # Production path: bf16 MXU matmuls with f32 accumulation (looser tolerance).
    audio_bf16 = jax.block_until_ready(
        istft_head_forward(x, weight, bias, n_fft=n_fft, hop=hop))
    np.testing.assert_allclose(np.asarray(audio_bf16), ref, rtol=5e-2, atol=5e-2)

    # Multi-tile path: exercises the OLA carry across T-tiles and tail-frame masking.
    T2 = 24
    x2 = jax.random.normal(kx2, (1, T2, D), jnp.float32)
    ref2 = istft_head_reference(x2, weight, bias, n_fft=n_fft, hop=hop)
    audio2 = jax.block_until_ready(
        istft_head_forward(x2, weight, bias, n_fft=n_fft, hop=hop, tile_t=8,
                           matmul_dtype=jnp.float32))
    np.testing.assert_allclose(np.asarray(audio2), ref2, rtol=2e-3, atol=2e-3)

    print("KERNEL_OK")
</pallas_src>

<mosaic_0001>
module attributes {stable_mosaic.version = 11 : i64} {
  func.func @kernel(%arg0: i32, %arg1: i32, %arg2: memref<1x16x32xf32, #tpu.memory_space<vmem>>, %arg3: memref<32x256xf32, #tpu.memory_space<vmem>>, %arg4: memref<1x256xf32, #tpu.memory_space<vmem>>, %arg5: memref<256x16xf32, #tpu.memory_space<vmem>>, %arg6: memref<16x4xf32, #tpu.memory_space<vmem>>, %arg7: memref<1x16x4xf32, #tpu.memory_space<vmem>>, %arg8: memref<8x4xf32, #tpu.memory_space<vmem>>) attributes {dimension_semantics = [#tpu.dimension_semantics<parallel>, #tpu.dimension_semantics<arbitrary>], iteration_bounds = array<i64: 2, 1>, scalar_prefetch = 0 : i64, scratch_operands = 1 : i64, tpu.core_type = #tpu.core_type<tc>, window_params = [{transform_indices = @transform_0, window_bounds = array<i64: 1, 16, 32>}, {pipeline_mode = #tpu.pipeline_mode<synchronous>, transform_indices = @transform_1, window_bounds = array<i64: 32, 256>}, {pipeline_mode = #tpu.pipeline_mode<synchronous>, transform_indices = @transform_2, window_bounds = array<i64: 1, 256>}, {pipeline_mode = #tpu.pipeline_mode<synchronous>, transform_indices = @transform_3, window_bounds = array<i64: 256, 16>}, {transform_indices = @transform_4, window_bounds = array<i64: 16, 4>}, {transform_indices = @transform_5, window_bounds = array<i64: 1, 16, 4>}]} {
    %c0_i32 = arith.constant 0 : i32
    %0 = arith.cmpi eq, %arg1, %c0_i32 : i32
    %1 = arith.extui %0 : i1 to i32
    %c0_i32_0 = arith.constant 0 : i32
    %2 = arith.cmpi ne, %1, %c0_i32_0 : i32
    scf.if %2 {
      %cst_23 = arith.constant 0.000000e+00 : f32
      %56 = vector.broadcast %cst_23 : f32 to vector<8x4xf32>
      %c0_24 = arith.constant 0 : index
      %c0_25 = arith.constant 0 : index
      %57 = vector.load %arg8[%c0_24, %c0_25] : memref<8x4xf32, #tpu.memory_space<vmem>>, vector<8x4xf32>
      tpu.vector_store %arg8[%c0_24, %c0_25], %56 {strides = array<i32>} : memref<8x4xf32, #tpu.memory_space<vmem>>, vector<8x4xf32>,
    } else {
    }
    %c0 = arith.constant 0 : index
    %c0_1 = arith.constant 0 : index
    %c0_2 = arith.constant 0 : index
    %3 = vector.load %arg2[%c0, %c0_1, %c0_2] : memref<1x16x32xf32, #tpu.memory_space<vmem>>, vector<1x16x32xf32>
    %4 = vector.shape_cast %3 : vector<1x16x32xf32> to vector<16x32xf32>
    %c0_3 = arith.constant 0 : index
    %c0_4 = arith.constant 0 : index
    %5 = vector.load %arg3[%c0_3, %c0_4] : memref<32x256xf32, #tpu.memory_space<vmem>>, vector<32x256xf32>
    %cst = arith.constant dense<0.000000e+00> : vector<16x256xf32>
    %6 = tpu.matmul %4, %5, %cst {dimension_numbers = #tpu.dot_dimension_numbers<[1], [0], [0], [1], [0, 0, 1, 1], [], []>} : vector<16x32xf32>, vector<32x256xf32>, vector<16x256xf32> -> vector<16x256xf32>
    %c0_5 = arith.constant 0 : index
    %c0_6 = arith.constant 0 : index
    %7 = vector.load %arg4[%c0_5, %c0_6] : memref<1x256xf32, #tpu.memory_space<vmem>>, vector<1x256xf32>
    %8 = vector.broadcast %7 : vector<1x256xf32> to vector<16x256xf32>
    %9 = arith.addf %6, %8 : vector<16x256xf32>
    %10 = vector.extract_strided_slice %9 {offsets = [0, 0], sizes = [16, 128], strides = [1, 1]} : vector<16x256xf32> to vector<16x128xf32>
    %11 = vector.extract_strided_slice %9 {offsets = [0, 128], sizes = [16, 128], strides = [1, 1]} : vector<16x256xf32> to vector<16x128xf32>
    %12 = math.exp %10 : vector<16x128xf32>
    %cst_7 = arith.constant 1.000000e+02 : f32
    %13 = vector.broadcast %cst_7 : f32 to vector<16x128xf32>
    %14 = arith.minimumf %12, %13 : vector<16x128xf32>
    %c16_i32 = arith.constant 16 : i32
    %15 = arith.muli %arg1, %c16_i32 : i32
    %16 = tpu.iota {dimensions = array<i32: 0>} : vector<16x1xi32>
    %17 = vector.broadcast %15 : i32 to vector<16x1xi32>
    %18 = arith.addi %17, %16 : vector<16x1xi32>
    %c8_i32 = arith.constant 8 : i32
    %19 = vector.broadcast %c8_i32 : i32 to vector<16x1xi32>
    %20 = arith.cmpi slt, %18, %19 : vector<16x1xi32>
    %cst_8 = arith.constant 0.000000e+00 : f32
    %21 = vector.shape_cast %20 : vector<16x1xi1> to vector<16x1xi1>
    %22 = vector.broadcast %21 : vector<16x1xi1> to vector<16x128xi1>
    %23 = vector.broadcast %cst_8 : f32 to vector<16x128xf32>
    %24 = arith.select %22, %14, %23 : vector<16x128xi1>, vector<16x128xf32>
    %25 = math.cos %11 : vector<16x128xf32>
    %26 = arith.mulf %24, %25 : vector<16x128xf32>
    %27 = math.sin %11 : vector<16x128xf32>
    %28 = arith.mulf %24, %27 : vector<16x128xf32>
    %29 = tpu.concatenate %26, %28 in 1 : vector<16x128xf32>, vector<16x128xf32> -> vector<16x256xf32>
    %c0_9 = arith.constant 0 : index
    %c0_10 = arith.constant 0 : index
    %30 = vector.load %arg5[%c0_9, %c0_10] : memref<256x16xf32, #tpu.memory_space<vmem>>, vector<256x16xf32>
    %cst_11 = arith.constant dense<0.000000e+00> : vector<16x16xf32>
    %31 = tpu.matmul %29, %30, %cst_11 {dimension_numbers = #tpu.dot_dimension_numbers<[1], [0], [0], [1], [0, 0, 1, 1], [], []>} : vector<16x256xf32>, vector<256x16xf32>, vector<16x16xf32> -> vector<16x16xf32>
    %cst_12 = arith.constant 0.000000e+00 : f32
    %32 = vector.broadcast %cst_12 : f32 to vector<8x16xf32>
    %33 = tpu.concatenate %31, %32 in 0 : vector<16x16xf32>, vector<8x16xf32> -> vector<24x16xf32>
    %c0_13 = arith.constant 0 : index
    %c0_14 = arith.constant 0 : index
    %34 = vector.load %arg8[%c0_13, %c0_14] : memref<8x4xf32, #tpu.memory_space<vmem>>, vector<8x4xf32>
    %cst_15 = arith.constant 0.000000e+00 : f32
    %35 = vector.broadcast %cst_15 : f32 to vector<16x4xf32>
    %36 = tpu.concatenate %34, %35 in 0 : vector<8x4xf32>, vector<16x4xf32> -> vector<24x4xf32>
    %37 = vector.extract_strided_slice %33 {offsets = [0, 0], sizes = [24, 4], strides = [1, 1]} : vector<24x16xf32> to vector<24x4xf32>
    %38 = arith.addf %36, %37 : vector<24x4xf32>
    %39 = vector.extract_strided_slice %33 {offsets = [0, 4], sizes = [24, 4], strides = [1, 1]} : vector<24x16xf32> to vector<24x4xf32>
    %c1_i32 = arith.constant 1 : i32
    %40 = tpu.dynamic_rotate %39 by %c1_i32 dim 0 : vector<24x4xf32>, i32 -> vector<24x4xf32>
    %41 = arith.addf %38, %40 : vector<24x4xf32>
    %42 = vector.extract_strided_slice %33 {offsets = [0, 8], sizes = [24, 4], strides = [1, 1]} : vector<24x16xf32> to vector<24x4xf32>
    %c2_i32 = arith.constant 2 : i32
    %43 = tpu.dynamic_rotate %42 by %c2_i32 dim 0 : vector<24x4xf32>, i32 -> vector<24x4xf32>
    %44 = arith.addf %41, %43 : vector<24x4xf32>
    %45 = vector.extract_strided_slice %33 {offsets = [0, 12], sizes = [24, 4], strides = [1, 1]} : vector<24x16xf32> to vector<24x4xf32>
    %c3_i32 = arith.constant 3 : i32
    %46 = tpu.dynamic_rotate %45 by %c3_i32 dim 0 : vector<24x4xf32>, i32 -> vector<24x4xf32>
    %47 = arith.addf %44, %46 : vector<24x4xf32>
    %48 = vector.extract_strided_slice %47 {offsets = [0, 0], sizes = [16, 4], strides = [1, 1]} : vector<24x4xf32> to vector<16x4xf32>
    %c0_16 = arith.constant 0 : index
    %c0_17 = arith.constant 0 : index
    %49 = vector.load %arg6[%c0_16, %c0_17] : memref<16x4xf32, #tpu.memory_space<vmem>>, vector<16x4xf32>
    %50 = arith.mulf %48, %49 : vector<16x4xf32>
    %c0_18 = arith.constant 0 : index
    %c0_19 = arith.constant 0 : index
    %c0_20 = arith.constant 0 : index
    %51 = vector.load %arg7[%c0_18, %c0_19, %c0_20] : memref<1x16x4xf32, #tpu.memory_space<vmem>>, vector<1x16x4xf32>
    %52 = vector.shape_cast %51 : vector<1x16x4xf32> to vector<16x4xf32>
    %53 = vector.shape_cast %50 : vector<16x4xf32> to vector<1x16x4xf32>
    tpu.vector_store %arg7[%c0_18, %c0_19, %c0_20], %53 {strides = array<i32>} : memref<1x16x4xf32, #tpu.memory_space<vmem>>, vector<1x16x4xf32>,
    %54 = vector.extract_strided_slice %47 {offsets = [16, 0], sizes = [8, 4], strides = [1, 1]} : vector<24x4xf32> to vector<8x4xf32>
    %c0_21 = arith.constant 0 : index
    %c0_22 = arith.constant 0 : index
    %55 = vector.load %arg8[%c0_21, %c0_22] : memref<8x4xf32, #tpu.memory_space<vmem>>, vector<8x4xf32>
    tpu.vector_store %arg8[%c0_21, %c0_22], %54 {strides = array<i32>} : memref<8x4xf32, #tpu.memory_space<vmem>>, vector<8x4xf32>,
    return
  }
  func.func @transform_0(%arg0: i32, %arg1: i32) -> (i32, i32, i32) {
    %c0_i32 = arith.constant 0 : i32
    %c0_i32_0 = arith.constant 0 : i32
    return %arg0, %arg1, %c0_i32 : i32, i32, i32
  }
  func.func @transform_1(%arg0: i32, %arg1: i32) -> (i32, i32) {
    %c0_i32 = arith.constant 0 : i32
    %c0_i32_0 = arith.constant 0 : i32
    %c0_i32_1 = arith.constant 0 : i32
    return %c0_i32, %c0_i32_0 : i32, i32
  }
  func.func @transform_2(%arg0: i32, %arg1: i32) -> (i32, i32) {
    %c0_i32 = arith.constant 0 : i32
    %c0_i32_0 = arith.constant 0 : i32
    %c0_i32_1 = arith.constant 0 : i32
    return %c0_i32, %c0_i32_0 : i32, i32
  }
  func.func @transform_3(%arg0: i32, %arg1: i32) -> (i32, i32) {
    %c0_i32 = arith.constant 0 : i32
    %c0_i32_0 = arith.constant 0 : i32
    %c0_i32_1 = arith.constant 0 : i32
    return %c0_i32, %c0_i32_0 : i32, i32
  }
  func.func @transform_4(%arg0: i32, %arg1: i32) -> (i32, i32) {
    %c0_i32 = arith.constant 0 : i32
    %c0_i32_0 = arith.constant 0 : i32
    return %arg1, %c0_i32 : i32, i32
  }
  func.func @transform_5(%arg0: i32, %arg1: i32) -> (i32, i32, i32) {
    %c0_i32 = arith.constant 0 : i32
    %c0_i32_0 = arith.constant 0 : i32
    return %arg0, %arg1, %c0_i32 : i32, i32, i32
  }
}

</mosaic_0001>

<bundles_post_ra>
// kernel: tpu_custom_call.1
= control target key start
LH: loop header
LB: loop body
LE: loop exit
PB: predicated region body
PF: predicated region fallthrough
CT: control target
= control target key end

     0   :  { %s1343_s18 = smov 0   ;;  %s1345_s19 = smov 0   ;;  %s1618_s0 = inlined_call_operand.vmem [shape: f32[2,16,32], index: 0, kind: input, shape index: {}]   ;;  %s1619_s1 = inlined_call_operand.vmem [shape: f32[32,256], index: 1, kind: input, shape index: {}]   ;;  %s1620_s2 = inlined_call_operand.vmem [shape: f32[1,256], index: 2, kind: input, shape index: {}]   ;;  %s1621_s3 = inlined_call_operand.vmem [shape: f32[256,16], index: 3, kind: input, shape index: {}]   ;;  %s1622_s4 = inlined_call_operand.vmem [shape: f32[16,4], index: 4, kind: input, shape index: {}]   ;;  %s1623_s5 = inlined_call_operand.vmem [shape: f32[2,16,4], index: 5, kind: output, shape index: {}]  }
   0x1   :  { %s1347_s20 = smov 0  }
   0x2 LB: > { %s27_s21 = sadd.s32 1, %s1297_s19  ;;  %p1122_p0 = scmp.ge.s32.totalorder %s1301_s20, 1  ;;  %s1301_s20 = sphi %s1347_s20, %s15_s20   ;;  %s1297_s19 = sphi %s1345_s19, %s1625_s19   ;;  %s1293_s18 = sphi %s1343_s18, %s1624_s18  }
   0x3   : > { %p29_p1 = scmp.ge.s32.totalorder %s27_s21, 2  ;;  %p219_p2 = scmp.lt.s32.totalorder %s1301_s20, 3 }
   0x5   : > { %s1627_s21 = smov (%p29_p1, %s27_s21), 0  ;;  %p220_p3 = pnand %p1122_p0, %p219_p2 }
   0x6   : > { %v295_v0 = vld [vmem:[%s1619_s1 + $0x8] sm:$0xff] (!%p220_p3)  ;;  %v297_v1 = vld [vmem:[%s1619_s1 + $0x18] sm:$0xff] (!%p220_p3)  ;;  %v294_v2 = vld [vmem:[%s1619_s1] sm:$0xff] (!%p220_p3)  ;;  %vm290_vm0 = vcmask (!%p220_p3), 31744   ;;  %p261_p4 = scmp.lt.s32.totalorder (!%p220_p3), %s1293_s18, 1  ;;  %v1303_v7 = vmov (!%p220_p3), 0.0   ;;  %v304_v63 = vlaneseq (!%p220_p3) }
   0x7   : > { %223 = sbr.rel (%p220_p3) target bundleno = 672 (0x2a0), region = 40  ;;  %v1187_v3 = vpack.c.bf16 (!%p220_p3), %v297_v1, %v295_v0  ;;  %v296_v4 = vld [vmem:[%s1619_s1 + $0x10] sm:$0xff] (!%p220_p3)  ;;  %v299_v5 = vld [vmem:[%s1619_s1 + $0x28] sm:$0xff] (!%p220_p3)  ;;  %v301_v6 = vld [vmem:[%s1619_s1 + $0x38] sm:$0xff] (!%p220_p3)  ;;  %291 = vst.msk [vmem:[#allocation2] sm:$0xff] (!%p220_p3), %vm290_vm0, %v1303_v7  ;;  %385 = vmatprep.mubr.f32.mxu0 (!%p220_p3), %v1303_v7  ;;  %vm314_vm1 = vcmask (!%p220_p3), 261120  }
   0x8   : > { %v1189_v8 = vpack.c.bf16 (!%p220_p3), %v296_v4, %v294_v2  ;;  %v1191_v9 = vpack.c.bf16 (!%p220_p3), %v301_v6, %v299_v5  ;;  %v298_v10 = vld [vmem:[%s1619_s1 + $0x20] sm:$0xff] (!%p220_p3)  ;;  %v300_v11 = vld [vmem:[%s1619_s1 + $0x30] sm:$0xff] (!%p220_p3)  ;;  %v854_v16 = vld [vmem:[%s1621_s3 + $0x88] sm:$0xff] (!%p220_p3)  ;;  %s1304_s25 = smov (!%p220_p3), 124   ;;  %s1305_s26 = smov (!%p220_p3), 120   ;;  %v1497_v0 = vshrl.u32 (!%p220_p3), %v304_v63, 7 }
   0x9   : > { %1188 = vmatprep.subr.bf16.mxu0 (!%p220_p3), %v1187_v3  ;;  %v1193_v12 = vpack.c.bf16 (!%p220_p3), %v300_v11, %v298_v10  ;;  %v853_v15 = vld [vmem:[%s1621_s3 + $0x80] sm:$0xff] (!%p220_p3)  ;;  %v838_v19 = vld [vmem:[%s1621_s3 + $0x8] sm:$0xff] (!%p220_p3)  ;;  %v855_v21 = vld [vmem:[%s1621_s3 + $0x90] sm:$0xff] (!%p220_p3)  ;;  %954 = vrot.lane.b32.xlu1 (!%p220_p3), %v1303_v7, %s1304_s25  ;;  %s1312_s29 = smov (!%p220_p3), 116  }
   0xa   : > { %1190 = vmatpush1.bf16.msra.mxu0 (!%p220_p3), %v1189_v8  ;;  %v1195_v17 = vpack.c.bf16 (!%p220_p3), %v854_v16, %v853_v15  ;;  %v837_v18 = vld [vmem:[%s1621_s3] sm:$0xff] (!%p220_p3)  ;;  %v856_v22 = vld [vmem:[%s1621_s3 + $0x98] sm:$0xff] (!%p220_p3)  ;;  %v839_v24 = vld [vmem:[%s1621_s3 + $0x10] sm:$0xff] (!%p220_p3)  ;;  %v310_v1 = vsub.s32 (!%p220_p3), 1, %v1497_v0 }
   0xb   : > { %1192 = vmatprep.subr.bf16.mxu0 (!%p220_p3), %v1191_v9  ;;  %v1197_v20 = vpack.c.bf16 (!%p220_p3), %v838_v19, %v837_v18  ;;  %v1199_v23 = vpack.c.bf16 (!%p220_p3), %v856_v22, %v855_v21  ;;  %v840_v25 = vld [vmem:[%s1621_s3 + $0x18] sm:$0xff] (!%p220_p3)  ;;  %v857_v27 = vld [vmem:[%s1621_s3 + $0xa0] sm:$0xff] (!%p220_p3)  ;;  %v858_v28 = vld [vmem:[%s1621_s3 + $0xa8] sm:$0xff] (!%p220_p3) }
   0xc   : > { %1196 = vmatprep.subr.bf16.mxu1 (!%p220_p3), %v1195_v17  ;;  %v1201_v26 = vpack.c.bf16 (!%p220_p3), %v840_v25, %v839_v24  ;;  %v1203_v29 = vpack.c.bf16 (!%p220_p3), %v858_v28, %v857_v27  ;;  %v841_v30 = vld [vmem:[%s1621_s3 + $0x20] sm:$0xff] (!%p220_p3)  ;;  %v842_v31 = vld [vmem:[%s1621_s3 + $0x28] sm:$0xff] (!%p220_p3)  ;;  %v859_v33 = vld [vmem:[%s1621_s3 + $0xb0] sm:$0xff] (!%p220_p3)  ;;  %v1306_v27 = vmov (!%p220_p3), 683565275  }
   0xd   : > { %1198 = vmatpush3.bf16.msra.mxu1 (!%p220_p3), %v1197_v20  ;;  %v1205_v32 = vpack.c.bf16 (!%p220_p3), %v842_v31, %v841_v30  ;;  %v860_v34 = vld [vmem:[%s1621_s3 + $0xb8] sm:$0xff] (!%p220_p3)  ;;  %v843_v36 = vld [vmem:[%s1621_s3 + $0x30] sm:$0xff] (!%p220_p3)  ;;  %v861_v39 = vld [vmem:[%s1621_s3 + $0xc0] sm:$0xff] (!%p220_p3)  ;;  %973 = vrot.lane.b32.xlu1 (!%p220_p3), %v1303_v7, %s1305_s26  ;;  %v1307_v31 = vmov (!%p220_p3), 2475754826  }
   0xe   : > { %s1629_s18 = smov (!%p261_p4, %s1293_s18), 1  ;;  %1194 = vmatpush1.bf16.msra.mxu0 %v1193_v12  ;;  %1200 = vmatprep.subr.bf16.mxu1 %v1199_v23  ;;  %v1207_v35 = vpack.c.bf16 %v860_v34, %v859_v33  ;;  %v844_v37 = vld [vmem:[%s1621_s3 + $0x38] sm:$0xff]  ;;  %v862_v40 = vld [vmem:[%s1621_s3 + $0xc8] sm:$0xff]  ;;  %v845_v42 = vld [vmem:[%s1621_s3 + $0x40] sm:$0xff]  ;;  %v1308_v33 = vmov 2131351028  }
   0xf   : > { %s1147_s13 = sshll.u32 %s1629_s18, 4  ;;  %v1209_v38 = vpack.c.bf16 %v844_v37, %v843_v36  ;;  %v1211_v41 = vpack.c.bf16 %v862_v40, %v861_v39  ;;  %v846_v43 = vld [vmem:[%s1621_s3 + $0x48] sm:$0xff]  ;;  %v863_v45 = vld [vmem:[%s1621_s3 + $0xd0] sm:$0xff]  ;;  %v864_v46 = vld [vmem:[%s1621_s3 + $0xd8] sm:$0xff]  ;;  %v1310_v37 = vmov 920167782  }
  0x10   : > { %s268_s16 = scalar_lea.vmem %s1618_s0, %s1147_s13  ;;  %v1213_v44 = vpack.c.bf16 %v846_v43, %v845_v42  ;;  %v847_v47 = vld [vmem:[%s1621_s3 + $0x50] sm:$0xff]  ;;  %v1215_v48 = vpack.c.bf16 %v864_v46, %v863_v45  ;;  %v848_v49 = vld [vmem:[%s1621_s3 + $0x58] sm:$0xff]  ;;  %v865_v50 = vld [vmem:[%s1621_s3 + $0xe0] sm:$0xff]  ;;  %s284_s9 = scalar_lea.vmem %s1623_s5, %s1147_s13 }
  0x11   : > { %v292_v13 = vld [vmem:[%s268_s16] sm:$0xff]  ;;  %v293_v14 = vld [vmem:[%s268_s16 + $0x8] sm:$0xff]  ;;  %1202 = vmatpush3.bf16.msra.mxu1 %v1201_v26  ;;  %v1217_v52 = vpack.c.bf16 %v848_v49, %v847_v47  ;;  %v867_v56 = vld [vmem:[%s1621_s3 + $0xf0] sm:$0xff] }
  0x12   : > { %1127 = vmatmul.mubr.msk.f32.vlgmr.msra.gmra.mrb[0].mxu0 %vm314_vm1, %v292_v13  ;;  %1204 = vmatprep.subr.bf16.mxu1 %v1203_v29  ;;  %v866_v51 = vld [vmem:[%s1621_s3 + $0xe8] sm:$0xff]  ;;  %v849_v54 = vld [vmem:[%s1621_s3 + $0x60] sm:$0xff]  ;;  %v868_v57 = vld [vmem:[%s1621_s3 + $0xf8] sm:$0xff] }
  0x13   : > { %391 = vmatprep.mubr.f32.mxu0 %v1303_v7  ;;  %v1219_v53 = vpack.c.bf16 %v866_v51, %v865_v50  ;;  %v850_v55 = vld [vmem:[%s1621_s3 + $0x68] sm:$0xff]  ;;  %v1223_v59 = vpack.c.bf16 %v868_v57, %v867_v56  ;;  %v851_v60 = vld [vmem:[%s1621_s3 + $0x70] sm:$0xff]  ;;  %v852_v61 = vld [vmem:[%s1621_s3 + $0x78] sm:$0xff] }
  0x14   : > { %v1221_v58 = vpack.c.bf16 %v850_v55, %v849_v54  ;;  %v1225_v62 = vpack.c.bf16 %v852_v61, %v851_v60  ;;  %v1503_v2 = vld [vmem:[%s1620_s2] sm:$0x3] }
  0x15   : > { %1206 = vmatpush3.bf16.msra.mxu1 %v1205_v32  ;;  %v311_v3 = vrot.slane %v1503_v2, %v310_v1 }
  0x16   : > { %1128 = vmatmul.mubr.msk.f32.gmra.mrb[2].mxu0 %vm314_vm1, %v293_v14  ;;  %1208 = vmatprep.subr.bf16.mxu1 %v1207_v35  ;;  %v1309_v35 = vmov 2102212464  }
  0x19   : > { %1210 = vmatpush3.bf16.msra.mxu1 %v1209_v38 }
  0x1a   : > { %1212 = vmatprep.subr.bf16.mxu1 %v1211_v41 }
  0x1d   : > { %1214 = vmatpush3.bf16.msra.mxu1 %v1213_v44  ;;  %v1311_v44 = vmov 1326507024  }
  0x1e   : > { %1216 = vmatprep.subr.bf16.mxu1 %v1215_v48 }
  0x21   : > { %1218 = vmatpush3.bf16.msra.mxu1 %v1217_v52 }
  0x22   : > { %1220 = vmatprep.subr.bf16.mxu1 %v1219_v53 }
  0x25   : > { %1222 = vmatpush3.bf16.msra.mxu1 %v1221_v58 }
  0x26   : > { %1224 = vmatprep.subr.bf16.mxu1 %v1223_v59 }
  0x29   : > { %1226 = vmatpush3.bf16.msra.mxu1 %v1225_v62 }
  0xe5   : > { %v1506_v4 = vpop.f32.mrb[0].mxu0 }
  0xe6   : > { %v389_v5 = vpop.f32.mrb[1].mxu0 }
  0xe7   : > { %v1508_v6 = vadd.f32 %v389_v5, %v311_v3 }
  0xe9   : > { %v419_v8 = vand.u32 2147483647, %v1508_v6  ;;  %v422_v9 = vand.u32 2139095040, %v1508_v6  ;;  %v393_v10 = vpop.f32.mrb[2].mxu0  ;;  %vm421_vm1 = vcmp.lt.s32.totalorder %v1508_v6, 0 }
  0xea   : > { %v395_v11 = vpop.f32.mrb[3].mxu0 }
  0xeb   : > { %v423_v12 = vshrl.u32 %v422_v9, 23  ;;  %v1512_v13 = vadd.f32 %v395_v11, %v311_v3  ;;  %v426_v14 = vand.u32 8388607, %v419_v8 }
  0xed   : > { %v1129_v15 = vadd.s32 4294967169, %v423_v12  ;;  %v525_v16 = vand.u32 2139095040, %v1512_v13  ;;  %v427_v18 = vor.u32 8388608, %v426_v14  ;;  %v522_v20 = vand.u32 2147483647, %v1512_v13 }
  0xef   : > { %v429_v17 = vadd.s32 1, %v1129_v15  ;;  %v526_v19 = vshrl.u32 %v525_v16, 23  ;;  %v1518_v25 = vshll.u32 %v427_v18, 8  ;;  %v529_v29 = vand.u32 8388607, %v522_v20 }
  0xf1   : > { %vm430_vm2 = vcmp.gt.s32.totalorder %v429_v17, 0  ;;  %v1133_v22 = vadd.s32 4294967169, %v526_v19  ;;  %v530_v59 = vor.u32 8388608, %v529_v29 }
  0xf2   : > { %v431_v21 = vsel %vm430_vm2, %v429_v17, 0  ;;  %vm420_vm2 = vcmp.le.f32.partialorder %v419_v8, 0.7853982 }
  0xf3   : > { %v432_v23 = vshrl.u32 %v431_v21, 5  ;;  %v433_v24 = vand.u32 31, %v431_v21  ;;  %v532_v30 = vadd.s32 1, %v1133_v22  ;;  %v570_v19 = vshll.u32 %v530_v59, 8 }
  0xf5   : > { %v434_v26 = vsub.s32 32, %v433_v24  ;;  %v436_v28 = vshll.u32 %v1306_v27, %v433_v24  ;;  %v439_v32 = vshll.u32 %v1307_v31, %v433_v24  ;;  %v442_v34 = vshll.u32 %v1308_v33, %v433_v24 }
  0xf6   : > { %v445_v36 = vshll.u32 %v1309_v35, %v433_v24  ;;  %v448_v38 = vshll.u32 %v1310_v37, %v433_v24  ;;  %vm451_vm3 = vcmp.lt.s32.totalorder %v432_v23, 1  ;;  %vm453_vm4 = vcmp.lt.s32.totalorder %v432_v23, 3 }
  0xf7   : > { %v437_v39 = vshrl.u32 %v1307_v31, %v434_v26  ;;  %v440_v40 = vshrl.u32 %v1308_v33, %v434_v26  ;;  %v443_v41 = vshrl.u32 %v1309_v35, %v434_v26  ;;  %v435_v42 = vshrl.u32 %v1306_v27, %v434_v26 }
  0xf8   : > { %v446_v43 = vshrl.u32 %v1310_v37, %v434_v26  ;;  %v449_v45 = vshrl.u32 %v1311_v44, %v434_v26  ;;  %vm533_vm5 = vcmp.gt.s32.totalorder %v532_v30, 0  ;;  %vm454_vm6 = vcmp.lt.s32.totalorder %v432_v23, 4 }
  0xf9   : > { %v438_v46 = vor.u32 %v437_v39, %v436_v28  ;;  %v441_v47 = vor.u32 %v440_v40, %v439_v32  ;;  %v444_v48 = vor.u32 %v443_v41, %v442_v34  ;;  %v534_v51 = vsel %vm533_vm5, %v532_v30, 0 }
  0xfa   : > { %v447_v49 = vor.u32 %v446_v43, %v445_v36  ;;  %v450_v50 = vor.u32 %v449_v45, %v448_v38  ;;  %vm452_vm7 = vcmp.lt.s32.totalorder %v432_v23, 2  ;;  %v536_v62 = vand.u32 31, %v534_v51 }
  0xfb   : > { %v455_v52 = vsel %vm451_vm3, %v435_v42, %v438_v46  ;;  %v456_v53 = vsel %vm454_vm6, %v444_v48, 2102212464  ;;  %v459_v54 = vsel %vm451_vm3, %v438_v46, %v441_v47  ;;  %v463_v55 = vsel %vm451_vm3, %v441_v47, %v444_v48 }
  0xfc   : > { %v457_v56 = vsel %vm453_vm4, %v441_v47, %v456_v53  ;;  %v460_v57 = vsel %vm454_vm6, %v447_v49, 920167782  ;;  %v464_v58 = vsel %vm454_vm6, %v450_v50, 1326507024  ;;  %v537_v12 = vsub.s32 32, %v536_v62 }
  0xfd   : > { %v461_v60 = vsel %vm453_vm4, %v444_v48, %v460_v57  ;;  %v465_v61 = vsel %vm453_vm4, %v447_v49, %v464_v58  ;;  %v458_v63 = vsel %vm452_vm7, %v455_v52, %v457_v56  ;;  %v539_v14 = vshll.u32 %v1306_v27, %v536_v62 }
  0xfe   : > { %v462_v1 = vsel %vm452_vm7, %v459_v54, %v461_v60  ;;  %v466_v3 = vsel %vm452_vm7, %v463_v55, %v465_v61  ;;  %v542_v15 = vshll.u32 %v1307_v31, %v536_v62  ;;  %v545_v16 = vshll.u32 %v1308_v33, %v536_v62 }
  0xff   : > { %v1531_v5 = vmul.u32.u64.low %v1518_v25, %v466_v3  ;;  %v1532_v9 = vmul.u32.u64.high %v1518_v25, %v466_v3, %v1531_v5  ;;  %v1535_v10 = vmul.u32.u64.low %v1518_v25, %v462_v1  ;;  %v1536_v11 = vmul.u32.u64.high %v1518_v25, %v462_v1, %v1535_v10 }
 0x100   : > { %v535_v17 = vshrl.u32 %v534_v51, 5  ;;  %v548_v18 = vshll.u32 %v1309_v35, %v536_v62  ;;  %v540_v21 = vshrl.u32 %v1307_v31, %v537_v12  ;;  %v543_v22 = vshrl.u32 %v1308_v33, %v537_v12 }
 0x101   : > { %v546_v23 = vshrl.u32 %v1309_v35, %v537_v12  ;;  %v551_v24 = vshll.u32 %v1310_v37, %v536_v62  ;;  %v474_v26 = vmul.u32 %v1518_v25, %v458_v63  ;;  %vm476_vm8 = vc.u32 %v1532_v9, %v1535_v10 }
 0x102   : > { %v477_v28 = vadd.s32 1, %v1536_v11  ;;  %v549_v29 = vshrl.u32 %v1310_v37, %v537_v12  ;;  %v541_v30 = vor.u32 %v540_v21, %v539_v14  ;;  %v544_v32 = vor.u32 %v543_v22, %v542_v15 }
 0x103   : > { %v547_v34 = vor.u32 %v546_v23, %v545_v16  ;;  %v552_v36 = vshrl.u32 %v1311_v44, %v537_v12  ;;  %v538_v39 = vshrl.u32 %v1306_v27, %v537_v12  ;;  %vm557_vm9 = vcmp.lt.s32.totalorder %v535_v17, 4 }
 0x104   : > { %v478_v38 = vsel %vm476_vm8, %v477_v28, %v1536_v11  ;;  %v550_v31 = vor.u32 %v549_v29, %v548_v18  ;;  %vm554_vm10 = vcmp.lt.s32.totalorder %v535_v17, 1  ;;  %vm556_vm11 = vcmp.lt.s32.totalorder %v535_v17, 3 }
 0x105   : > { %v479_v33 = vadd.s32 %v478_v38, %v474_v26  ;;  %v553_v35 = vor.u32 %v552_v36, %v551_v24  ;;  %v559_v25 = vsel %vm557_vm9, %v547_v34, 2102212464  ;;  %v562_v40 = vsel %vm554_vm10, %v541_v30, %v544_v32 }
 0x106   : > { %v563_v41 = vsel %vm557_vm9, %v550_v31, 920167782  ;;  %v566_v42 = vsel %vm554_vm10, %v544_v32, %v547_v34  ;;  %vm555_vm12 = vcmp.lt.s32.totalorder %v535_v17, 2  ;;  %v558_v46 = vsel %vm554_vm10, %v538_v39, %v541_v30 }
 0x107   : > { %v480_v43 = vadd.s32 536870912, %v479_v33  ;;  %v564_v37 = vsel %vm556_vm11, %v547_v34, %v563_v41  ;;  %v567_v45 = vsel %vm557_vm9, %v553_v35, 1326507024  ;;  %v560_v44 = vsel %vm556_vm11, %v544_v32, %v559_v25 }
 0x108   : > { %v565_v47 = vsel %vm555_vm12, %v562_v40, %v564_v37  ;;  %v568_v48 = vsel %vm556_vm11, %v550_v31, %v567_v45  ;;  %v561_v55 = vsel %vm555_vm12, %v558_v46, %v560_v44  ;;  %v475_v15 = vadd.s32 %v1535_v10, %v1532_v9 }
 0x109   : > { %v481_v49 = vshrl.u32 %v480_v43, 30  ;;  %v569_v27 = vsel %vm555_vm12, %v566_v42, %v568_v48  ;;  %v1546_v50 = vmul.u32.u64.low %v570_v19, %v565_v47  ;;  %v1547_v51 = vmul.u32.u64.high %v570_v19, %v565_v47, %v1546_v50 }
 0x10a   : > { %v1549_v52 = vmul.u32.u64.low %v570_v19, %v569_v27  ;;  %v1550_v53 = vmul.u32.u64.high %v570_v19, %v569_v27, %v1549_v52  ;;  %v577_v58 = vmul.u32 %v570_v19, %v561_v55  ;;  %v306_v19 = vsub.s32 0, %v1497_v0 }
 0x10b   : > { %v482_v54 = vshll.u32 %v481_v49, 30  ;;  %v580_v57 = vadd.s32 1, %v1547_v51  ;;  %v505_v31 = vsub.s32 4, %v481_v49  ;;  %vm524_vm3 = vcmp.lt.s32.totalorder %v1512_v13, 0 }
 0x10c   : > { %vm579_vm13 = vc.u32 %v1550_v53, %v1546_v50  ;;  %v307_v30 = vrot.slane %v1503_v2, %v306_v19  ;;  %vm523_vm4 = vcmp.le.f32.partialorder %v522_v20, 0.7853982  ;;  %vm511_vm5 = vweird.f32 %v1508_v6 }
 0x10d   : > { %v483_v56 = vsub.s32 %v479_v33, %v482_v54  ;;  %v581_v60 = vsel %vm579_vm13, %v580_v57, %v1547_v51  ;;  %v578_v33 = vadd.s32 %v1546_v50, %v1550_v53  ;;  %v506_v45 = vsel %vm421_vm1, %v505_v31, %v481_v49 }
 0x10e   : > { %v582_v61 = vadd.s32 %v581_v60, %v577_v58  ;;  %v388_v9 = vadd.f32 %v1506_v4, %v307_v30  ;;  %v508_v48 = vsel %vm420_vm2, 0, %v506_v45 }
 0x10f   : > { %v485_v59 = vsub.s32 0, %v483_v56  ;;  %v720_v51 = vadd.s32 3, %v508_v48  ;;  %v512_v55 = vand.u32 3, %v508_v48 }
 0x110   : > { %v583_v63 = vadd.s32 536870912, %v582_v61  ;;  %v398_v43 = vmul.f32 1.442695, %v388_v9 }
 0x111   : > { %v1130_v62 = vmin.u32 %v485_v59, %v483_v56  ;;  %v721_v8 = vand.u32 3, %v720_v51  ;;  %vm517_vm6 = vcmp.eq.s32.totalorder %v512_v55, 2  ;;  %vm514_vm8 = vcmp.eq.s32.totalorder %v512_v55, 0 }
 0x112   : > { %v584_v3 = vshrl.u32 %v583_v63, 30  ;;  %vm513_vm10 = vcmp.lt.s32.totalorder %v512_v55, 2 }
 0x113   : > { %v487_v1 = vclz %v1130_v62  ;;  %vm726_vm7 = vcmp.eq.s32.totalorder %v721_v8, 2  ;;  %vm723_vm9 = vcmp.eq.s32.totalorder %v721_v8, 0  ;;  %vm722_vm11 = vcmp.lt.s32.totalorder %v721_v8, 2 }
 0x114   : > { %v585_v11 = vshll.u32 %v584_v3, 30  ;;  %v608_v53 = vsub.s32 4, %v584_v3 }
 0x115   : > { %v1131_v5 = vadd.s32 4294967294, %v487_v1 }
 0x116   : > { %v586_v14 = vsub.s32 %v582_v61, %v585_v11 }
 0x117   : > { %vm1132_vm14 = vcmp.lt.s32.totalorder %v1131_v5, 0 }
 0x118   : > { %v490_v12 = vsel %vm1132_vm14, 0, %v1131_v5  ;;  %v588_v18 = vsub.s32 0, %v586_v14 }
 0x119   : > { %v491_v16 = vsub.s32 32, %v490_v12  ;;  %v495_v17 = vsub.s32 4294967266, %v490_v12  ;;  %v492_v21 = vshll.u32 %v483_v56, %v490_v12  ;;  %v609_v56 = vsel %vm524_vm3, %v608_v53, %v584_v3 }
 0x11a   : > { %v1134_v24 = vmin.u32 %v588_v18, %v586_v14  ;;  %v611_v63 = vsel %vm523_vm4, 0, %v609_v56 }
 0x11b   : > { %v493_v22 = vshrl.u32 %v475_v15, %v491_v16  ;;  %v496_v23 = vadd.s32 127, %v495_v17  ;;  %v824_v15 = vadd.s32 3, %v611_v63 }
 0x11c   : > { %v590_v29 = vclz %v1134_v24 }
 0x11d   : > { %v494_v26 = vor.u32 %v493_v22, %v492_v21  ;;  %v497_v28 = vshll.u32 %v496_v23, 23  ;;  %v825_v21 = vand.u32 3, %v824_v15  ;;  %v615_v22 = vand.u32 3, %v611_v63 }
 0x11e   : > { %v1135_v34 = vadd.s32 4294967294, %v590_v29 }
 0x11f   : > { %v498_v32 = vor.u32 4788187, %v497_v28  ;;  %v501_v38 = vcvt.s32.f32 %v494_v26  ;;  %vm830_vm12 = vcmp.eq.s32.totalorder %v825_v21, 2  ;;  %vm620_vm13 = vcmp.eq.s32.totalorder %v615_v22, 2 }
 0x120   : > { %vm1136_vm15 = vcmp.lt.s32.totalorder %v1135_v34, 0  ;;  %vm827_vm14 = vcmp.eq.s32.totalorder %v825_v21, 0 }
 0x121   : > { %v499_v36 = vand.u32 2147483647, %v498_v32  ;;  %v593_v39 = vsel %vm1136_vm15, 0, %v1135_v34  ;;  %vm617_vm15 = vcmp.eq.s32.totalorder %v615_v22, 0 }
 0x122   : > { %v594_v35 = vsub.s32 32, %v593_v39  ;;  %v598_v25 = vsub.s32 4294967266, %v593_v39  ;;  %v595_v41 = vshll.u32 %v586_v14, %v593_v39 }
 0x123   : > { %v502_v10 = vmul.f32 %v501_v38, %v499_v36 }
 0x124   : > { %v596_v42 = vshrl.u32 %v578_v33, %v594_v35  ;;  %v599_v2 = vadd.s32 127, %v598_v25 }
 0x125   : > { %v503_v40 = vxor.u32 2147483648, %v502_v10 }
 0x126   : > { %v597_v4 = vor.u32 %v596_v42, %v595_v41  ;;  %v600_v46 = vshll.u32 %v599_v2, 23  ;;  %v955_v41 = vpop.permute.xlu1 %954 }
 0x127   : > { %v504_v37 = vsel %vm421_vm1, %v503_v40, %v502_v10  ;;  %vm826_vm1 = vcmp.lt.s32.totalorder %v825_v21, 2  ;;  %v961_v45 = vrot.slane %v955_v41, 7 }
 0x128   : > { %v507_v44 = vsel %vm420_vm2, %v1508_v6, %v504_v37  ;;  %v601_v47 = vor.u32 4788187, %v600_v46  ;;  %v604_v50 = vcvt.s32.f32 %v597_v4  ;;  %vm616_vm2 = vcmp.lt.s32.totalorder %v615_v22, 2 }
 0x129   : > { %1269 = vcosq.f32 %v507_v44 }
 0x12a   : > { %1271 = vsinq.f32 %v507_v44  ;;  %v602_v27 = vand.u32 2147483647, %v601_v47  ;;  %v974_v2 = vpop.permute.xlu1 %973  ;;  %v944_v44 = vld [vmem:[#allocation2] sm:$0xff] }
 0x12b   : > { %1273 = vpow2.f32 %v398_v43 }
 0x12c   : > { %v605_v52 = vmul.f32 %v604_v50, %v602_v27 }
 0x12e   : > { %v606_v54 = vxor.u32 2147483648, %v605_v52 }
 0x130   : > { %v607_v49 = vsel %vm524_vm3, %v606_v54, %v605_v52  ;;  %vm614_vm3 = vweird.f32 %v1512_v13 }
 0x131   : > { %v610_v58 = vsel %vm523_vm4, %v1512_v13, %v607_v49  ;;  %vm962_vm4 = vcmp.lt.s32.totalorder %v1497_v0, 1 }
 0x132   : > { %1275 = vcosq.f32 %v610_v58 }
 0x133   : > { %v1270_v57 = vpop.eup %1269  ;;  %1277 = vsinq.f32 %v610_v58 }
 0x134   : > { %v1272_v59 = vpop.eup %1271  ;;  %v518_v60 = vxor.u32 2147483648, %v1270_v57 }
 0x135   : > { %v1274_v61 = vpop.eup %1273  ;;  %v515_v62 = vxor.u32 2147483648, %v1272_v59 }
 0x136   : > { %v519_v1 = vsel %vm517_vm6, %v518_v60, %v1272_v59  ;;  %v728_v20 = vsel %vm726_vm7, %v518_v60, %v1272_v59  ;;  %v402_v11 = vmin.f32 %v1274_v61, 100.0  ;;  %vm1000_vm6 = vcmp.lt.s32.totalorder %v1497_v0, 3 }
 0x137   : > { %v516_v3 = vsel %vm514_vm8, %v1270_v57, %v515_v62  ;;  %v725_v5 = vsel %vm723_vm9, %v1270_v57, %v515_v62 }
 0x138   : > { %v520_v12 = vsel %vm513_vm10, %v516_v3, %v519_v1  ;;  %v729_v14 = vsel %vm722_vm11, %v725_v5, %v728_v20  ;;  %v1008_v1 = vld [vmem:[%s1622_s4 + $0x8] sm:$0xff] }
 0x139   : > { %v521_v16 = vsel %vm511_vm5, nan, %v520_v12  ;;  %v730_v17 = vsel %vm511_vm5, nan, %v729_v14  ;;  %vm981_vm5 = vcmp.lt.s32.totalorder %v1497_v0, 2  ;;  %v1007_v12 = vld [vmem:[%s1622_s4] sm:$0xff] }
 0x13a   : > { %v835_v18 = vmul.f32 %v730_v17, %v402_v11  ;;  %v625_v19 = vmul.f32 %v521_v16, %v402_v11 }
 0x13c   : > { %933 = vmatprep.mubr.f32.mxu1 %v835_v18  ;;  %v1276_v23 = vpop.eup %1275 }
 0x13d   : > { %934 = vmatmul.mubr.f32.vlgmr.msra.gmra.mrb[0].mxu1 %v625_v19  ;;  %v1278_v24 = vpop.eup %1277  ;;  %v621_v26 = vxor.u32 2147483648, %v1276_v23 }
 0x13e   : > { %v618_v28 = vxor.u32 2147483648, %v1278_v24 }
 0x13f   : > { %v832_v29 = vsel %vm830_vm12, %v621_v26, %v1278_v24  ;;  %v622_v30 = vsel %vm620_vm13, %v621_v26, %v1278_v24 }
 0x140   : > { %v829_v32 = vsel %vm827_vm14, %v1276_v23, %v618_v28  ;;  %v619_v6 = vsel %vm617_vm15, %v1276_v23, %v618_v28 }
 0x141   : > { %v833_v34 = vsel %vm826_vm1, %v829_v32, %v832_v29  ;;  %v623_v36 = vsel %vm616_vm2, %v619_v6, %v622_v30 }
 0x142   : > { %v834_v38 = vsel %vm614_vm3, nan, %v833_v34  ;;  %v624_v9 = vsel %vm614_vm3, nan, %v623_v36 }
 0x143   : > { %v836_v10 = vmul.f32 0.0, %v834_v38  ;;  %v626_v39 = vmul.f32 0.0, %v624_v9 }
 0x145   : > { %938 = vmatprep.mubr.f32.mxu1 %v836_v10 }
 0x146   : > { %939 = vmatmul.mubr.f32.gmra.mrb[2].mxu1 %v626_v39 }
 0x210   : > { %v1181_v31 = vpop.f32.mrb[0].mxu1 }
 0x211   : > { %v1182_v33 = vpop.f32.mrb[1].mxu1 }
 0x212   : > { %v1183_v35 = vadd.f32 %v1182_v33, %v1181_v31 }
 0x214   : > { %969 = vrot.lane.b32.xlu1 %v1183_v35, %s1305_s26  ;;  %950 = vrot.lane.b32.xlu0 %v1183_v35, %s1304_s25  ;;  %v945_v51 = vadd.f32 %v1183_v35, %v944_v44 }
 0x218   : > { %988 = vrot.lane.b32.xlu0 %v1183_v35, %s1312_s29 }
 0x219   : > { %v1184_v25 = vpop.f32.mrb[2].mxu1 }
 0x21a   : > { %v1185_v40 = vpop.f32.mrb[3].mxu1 }
 0x21b   : > { %v1186_v13 = vadd.f32 %v1185_v40, %v1184_v25 }
 0x21d   : > { %990 = vrot.lane.b32.xlu1 %v1186_v13, %s1312_s29  ;;  %952 = vrot.lane.b32.xlu0 %v1186_v13, %s1304_s25 }
 0x221   : > { %971 = vrot.lane.b32.xlu0 %v1186_v13, %s1305_s26 }
 0x225   : > { %992 = vrot.lane.b32.xlu0 %v1303_v7, %s1312_s29  ;;  %v980_v7 = vrot.slane %v974_v2, 6 }
 0x286   : > { %v951_v42 = vpop.permute.xlu0 %950  ;;  %v970_v37 = vpop.permute.xlu1 %969 }
 0x287   : > { %v959_v4 = vrot.slane %v951_v42, 7  ;;  %v978_v53 = vrot.slane %v970_v37, 6 }
 0x289   : > { %v965_v27 = vsel %vm962_vm4, %v961_v45, %v959_v4  ;;  %v984_v61 = vsel %vm981_vm5, %v980_v7, %v978_v53 }
 0x28a   : > { %v989_v43 = vpop.permute.xlu0 %988  ;;  %v966_v49 = vadd.f32 %v965_v27, %v945_v51 }
 0x28b   : > { %v997_v55 = vrot.slane %v989_v43, 5 }
 0x28c   : > { %v985_v11 = vadd.f32 %v984_v61, %v966_v49 }
 0x28f   : > { %v953_v46 = vpop.permute.xlu0 %952  ;;  %v991_v48 = vpop.permute.xlu1 %990 }
 0x290   : > { %v960_v47 = vrot.slane %v953_v46, 7  ;;  %v998_v54 = vrot.slane %v991_v48, 5 }
 0x292   : > { %v964_v50 = vsel %vm962_vm4, %v959_v4, %v960_v47  ;;  %v1002_v62 = vsel %vm1000_vm6, %v997_v55, %v998_v54  ;;  %v963_v63 = vsel %vm962_vm4, %v960_v47, %v961_v45 }
 0x293   : > { %v972_v52 = vpop.permute.xlu0 %971  ;;  %v967_v56 = vadd.f32 %v1186_v13, %v964_v50 }
 0x294   : > { %v979_v8 = vrot.slane %v972_v52, 6 }
 0x296   : > { %v982_v57 = vsel %vm981_vm5, %v979_v8, %v980_v7  ;;  %v983_v58 = vsel %vm981_vm5, %v978_v53, %v979_v8 }
 0x297   : > { %v986_v59 = vadd.f32 %v983_v58, %v967_v56  ;;  %v993_v60 = vpop.permute.xlu0 %992  ;;  %v987_v3 = vadd.f32 %v982_v57, %v963_v63 }
 0x298   : > { %v999_v20 = vrot.slane %v993_v60, 5 }
 0x299   : > { %v1005_v5 = vadd.f32 %v1002_v62, %v986_v59 }
 0x29a   : > { %v1001_v14 = vsel %vm1000_vm6, %v998_v54, %v999_v20  ;;  %v1003_v15 = vsel %vm1000_vm6, %v999_v20, %v997_v55 }
 0x29b   : > { %v1010_v16 = vmul.f32 %v1008_v1, %v1005_v5  ;;  %v1004_v17 = vadd.f32 %v1003_v15, %v985_v11  ;;  %v1006_v18 = vadd.f32 %v1001_v14, %v987_v3 }
 0x29d   : > { %1013 = vst.msk [vmem:[%s284_s9 + $0x8] sm:$0xff] %vm290_vm0, %v1010_v16  ;;  %v1009_v19 = vmul.f32 %v1007_v12, %v1004_v17  ;;  %1014 = vst.msk [vmem:[#allocation2] sm:$0xff] %vm290_vm0, %v1006_v18 }
 0x29f   : > { %1012 = vst.msk [vmem:[%s284_s9] sm:$0xff] %vm290_vm0, %v1009_v19 }
 0x2a0 PF: > { %s15_s20 = sadd.s32 1, %s1301_s20   ;;  %s1624_s18 = smov %s1297_s19 }
 0x2a1   : > { %p12_p5 = scmp.ge.s32.totalorder %s15_s20, 4   ;;  %s1625_s19 = smov %s1627_s21 }
 0x2a3   :  { %14 = sbr.rel (!%p12_p5) target bundleno = 2 (0x2), region = 77 }

</bundles_post_ra>
